<compile_context>
chip_gen: v5e
topology: v5e:2x2
jax: 0.10.0
libtpu: 0.0.40
codegen_flags: <defaults>
</compile_context>

<pallas_src>
import jax
import jax.numpy as jnp
import numpy as np
from jax.experimental import pallas as pl
from jax.experimental.pallas import tpu as pltpu


# ---------------------------------------------------------------------------
# Pallas kernel: grouped SwiGLU expert FFN
# ---------------------------------------------------------------------------
def _grouped_ffn_kernel(tile_expert_ref, tile_nrows_ref,   # scalar prefetch (SMEM)
                        x_ref, w1_ref, w3_ref, w2_ref, wt_ref,
                        o_ref, acc_ref):
    t = pl.program_id(0)          # routed-token tile (parallel)
    h = pl.program_id(1)          # FFN hidden-dim tile (arbitrary, accumulated)

    @pl.when(h == 0)
    def _():
        acc_ref[...] = jnp.zeros_like(acc_ref)

    # Skip all MXU work for tiles with no routed tokens (empty experts / tail pad).
    @pl.when(tile_nrows_ref[t] > 0)
    def _():
        x = x_ref[...]                                                      # (tT, D)  model dtype
        g = jnp.dot(x, w1_ref[...], preferred_element_type=jnp.float32)     # (tT, tH) f32
        u = jnp.dot(x, w3_ref[...], preferred_element_type=jnp.float32)     # (tT, tH) f32
        act = (g * jax.nn.sigmoid(g)) * u                                   # SiLU(gate) * up
        acc_ref[...] += jnp.dot(act.astype(x.dtype), w2_ref[...],
                                preferred_element_type=jnp.float32)          # (tT, D) f32

    @pl.when(h == pl.num_programs(1) - 1)
    def _():
        # Per-assignment routing weight applied once, after full-H accumulation.
        o_ref[...] = (acc_ref[...] * wt_ref[...]).astype(o_ref.dtype)


def grouped_expert_ffn(x_pad, w1, w3, w2, wt_pad, tile_expert, tile_nrows,
                       *, tile_t, tile_h, vmem_limit_bytes=None):
    A_pad, D = x_pad.shape
    E, _, H = w1.shape
    assert tile_t % 8 == 0, "token tile must be a multiple of 8 (sublane)"
    assert A_pad % tile_t == 0 and H % tile_h == 0

    n_t = A_pad // tile_t
    n_h = H // tile_h

    grid_spec = pltpu.PrefetchScalarGridSpec(
        num_scalar_prefetch=2,
        grid=(n_t, n_h),
        in_specs=[
            # routed/packed tokens: block index invariant over h -> no re-DMA across H
            pl.BlockSpec((tile_t, D), lambda t, h, te, tn: (t, 0)),
            # expert weights: data-dependent expert index from scalar prefetch
            pl.BlockSpec((None, D, tile_h), lambda t, h, te, tn: (te[t], 0, h)),   # W1[e] gate
            pl.BlockSpec((None, D, tile_h), lambda t, h, te, tn: (te[t], 0, h)),   # W3[e] up
            pl.BlockSpec((None, tile_h, D), lambda t, h, te, tn: (te[t], h, 0)),   # W2[e] down
            # per-assignment routing weight (f32)
            pl.BlockSpec((tile_t, 1), lambda t, h, te, tn: (t, 0)),
        ],
        out_specs=pl.BlockSpec((tile_t, D), lambda t, h, te, tn: (t, 0)),
        scratch_shapes=[pltpu.VMEM((tile_t, D), jnp.float32)],
    )
    return pl.pallas_call(
        _grouped_ffn_kernel,
        out_shape=jax.ShapeDtypeStruct((A_pad, D), x_pad.dtype),
        grid_spec=grid_spec,
        compiler_params=pltpu.CompilerParams(
            dimension_semantics=(pltpu.PARALLEL, pltpu.ARBITRARY),
            vmem_limit_bytes=vmem_limit_bytes,
        ),
    )(tile_expert, tile_nrows, x_pad, w1, w3, w2, wt_pad)


# ---------------------------------------------------------------------------
# Full sparse MoE block forward
# ---------------------------------------------------------------------------
def sparse_moe_block(hidden_states, wg, w1, w3, w2, top_k,
                     *, tile_t=None, tile_h=None, vmem_limit_bytes=None):
    """Forward pass of SparseMoeBlockHFMixtral (grouped-matmul Pallas path)."""
    input_shape = hidden_states.shape
    D = input_shape[-1]
    E, _, H = w1.shape
    dtype = hidden_states.dtype
    x = hidden_states.reshape(-1, D)
    T = x.shape[0]
    K = top_k
    A = T * K                                   # number of (token, expert) assignments

    if tile_t is None:
        tile_t = min(256, max(16, ((A + 15) // 16) * 16))
    if tile_h is None:
        tile_h = next((c for c in (512, 256, 128) if H % c == 0), H)

    # ---- router (XLA glue; lane-sparse (T, E<<128) gemm is not worth a kernel) ----
    logits = jnp.dot(x, wg, preferred_element_type=jnp.float32)     # (T, E) f32
    probs = jax.nn.softmax(logits, axis=-1)                         # softmax in f32
    top_w, top_idx = jax.lax.top_k(probs, K)                        # (T, K)
    top_w = top_w / jnp.sum(top_w, axis=-1, keepdims=True)          # renormalize
    top_w = top_w.astype(dtype)                                     # torch: .to(hidden dtype)

    # ---- grouped routing metadata: sort assignments by expert, pack tile-aligned ----
    flat_e = top_idx.reshape(A).astype(jnp.int32)
    flat_t = jnp.repeat(jnp.arange(T, dtype=jnp.int32), K)
    flat_w = top_w.reshape(A)

    order = jnp.argsort(flat_e)
    se, st, sw = flat_e[order], flat_t[order], flat_w[order]

    counts = jnp.bincount(flat_e, length=E).astype(jnp.int32)               # assignments per expert
    padded_counts = ((counts + tile_t - 1) // tile_t) * tile_t              # tile-aligned groups
    zero = jnp.zeros((1,), jnp.int32)
    group_starts = jnp.concatenate([zero, jnp.cumsum(counts)[:-1].astype(jnp.int32)])
    padded_starts = jnp.concatenate([zero, jnp.cumsum(padded_counts)[:-1].astype(jnp.int32)])

    rank = jnp.arange(A, dtype=jnp.int32) - group_starts[se]                # rank within expert group
    pos = padded_starts[se] + rank                                          # row in packed layout

    A_pad = (pl.cdiv(A, tile_t) + E) * tile_t                               # static upper bound
    n_tiles = A_pad // tile_t

    # Packed operands (padding rows stay zero -> zero contribution).
    x_pad = jnp.zeros((A_pad, D), dtype).at[pos].set(x[st])
    wt_pad = jnp.zeros((A_pad, 1), jnp.float32).at[pos].set(sw.astype(jnp.float32)[:, None])
    tok_pad = jnp.zeros((A_pad,), jnp.int32).at[pos].set(st)

    # Per-tile scalar-prefetch metadata: which expert owns each tile + #real rows.
    tile_start = jnp.arange(n_tiles, dtype=jnp.int32) * tile_t
    padded_ends = padded_starts + padded_counts
    in_grp = ((tile_start[:, None] >= padded_starts[None, :]) &
              (tile_start[:, None] < padded_ends[None, :]))
    tile_expert = jnp.argmax(in_grp, axis=1).astype(jnp.int32)              # 0 for unused tail tiles
    has_work = jnp.any(in_grp, axis=1)
    real_end = padded_starts + counts
    tile_nrows = jnp.where(has_work,
                           jnp.clip(real_end[tile_expert] - tile_start, 0, tile_t),
                           0).astype(jnp.int32)

    # ---- grouped expert FFN (Pallas) ----
    y_pad = grouped_expert_ffn(x_pad, w1, w3, w2, wt_pad, tile_expert, tile_nrows,
                               tile_t=tile_t, tile_h=tile_h,
                               vmem_limit_bytes=vmem_limit_bytes)

    # ---- scatter-add back to tokens (the reference's index_add_) ----
    out = jnp.zeros((T, D), jnp.float32).at[tok_pad].add(y_pad.astype(jnp.float32))
    return out.astype(dtype).reshape(input_shape)


# ---------------------------------------------------------------------------
# Plain-JAX reference (dense over experts, for verification)
# ---------------------------------------------------------------------------
def ref_sparse_moe(hidden_states, wg, w1, w3, w2, top_k):
    input_shape = hidden_states.shape
    D = input_shape[-1]
    E = wg.shape[1]
    dtype = hidden_states.dtype
    x = hidden_states.reshape(-1, D)
    logits = jnp.dot(x, wg, preferred_element_type=jnp.float32)
    probs = jax.nn.softmax(logits, axis=-1)
    top_w, top_idx = jax.lax.top_k(probs, top_k)
    top_w = top_w / jnp.sum(top_w, axis=-1, keepdims=True)
    top_w = top_w.astype(dtype)
    wt_dense = jnp.sum(jax.nn.one_hot(top_idx, E, dtype=jnp.float32)
                       * top_w.astype(jnp.float32)[..., None], axis=1)        # (T, E) f32
    g = jnp.einsum("td,edh->eth", x, w1, preferred_element_type=jnp.float32)
    u = jnp.einsum("td,edh->eth", x, w3, preferred_element_type=jnp.float32)
    act = (g * jax.nn.sigmoid(g)) * u
    y = jnp.einsum("eth,ehd->etd", act.astype(dtype), w2,
                   preferred_element_type=jnp.float32)
    contrib = (y * jnp.transpose(wt_dense, (1, 0))[:, :, None]).astype(dtype)
    out = jnp.sum(contrib.astype(jnp.float32), axis=0)
    return out.astype(dtype).reshape(input_shape)


# ---------------------------------------------------------------------------
if __name__ == "__main__":
    # small shapes: batch=2, seq=8, dim=128, hidden_dim=256, 8 experts, top_k=2
    B, S, D, H, E, K = 2, 8, 128, 256, 8, 2
    key = jax.random.PRNGKey(0)
    k_x, k_g, k_1, k_3, k_2 = jax.random.split(key, 5)

    dtype = jnp.bfloat16  # realistic Mixtral dtype; feeds the MXU bf16 operands
    hidden_states = jax.random.normal(k_x, (B, S, D), dtype=jnp.float32).astype(dtype)
    wg = (jax.random.normal(k_g, (D, E), dtype=jnp.float32) * 0.05).astype(dtype)     # gate
    w1 = (jax.random.normal(k_1, (E, D, H), dtype=jnp.float32) * 0.05).astype(dtype)  # gate_proj
    w3 = (jax.random.normal(k_3, (E, D, H), dtype=jnp.float32) * 0.05).astype(dtype)  # up_proj
    w2 = (jax.random.normal(k_2, (E, H, D), dtype=jnp.float32) * 0.05).astype(dtype)  # down_proj

    # small tiles so the test exercises multiple token tiles and H accumulation
    out = sparse_moe_block(hidden_states, wg, w1, w3, w2, K, tile_t=16, tile_h=128)
    out = jax.block_until_ready(out)

    ref = jax.block_until_ready(ref_sparse_moe(hidden_states, wg, w1, w3, w2, K))
    np.testing.assert_allclose(np.asarray(out, dtype=np.float32),
                               np.asarray(ref, dtype=np.float32),
                               rtol=2e-2, atol=2e-2)

    print("KERNEL_OK")
</pallas_src>

<mosaic_0001>
module attributes {stable_mosaic.version = 11 : i64} {
  func.func @_grouped_ffn_kernel(%arg0: i32, %arg1: i32, %arg2: memref<10xi32, #tpu.memory_space<smem>>, %arg3: memref<10xi32, #tpu.memory_space<smem>>, %arg4: memref<16x128xbf16, #tpu.memory_space<vmem>>, %arg5: memref<1x128x128xbf16, #tpu.memory_space<vmem>>, %arg6: memref<1x128x128xbf16, #tpu.memory_space<vmem>>, %arg7: memref<1x128x128xbf16, #tpu.memory_space<vmem>>, %arg8: memref<16x1xf32, #tpu.memory_space<vmem>>, %arg9: memref<16x128xbf16, #tpu.memory_space<vmem>>, %arg10: memref<16x128xf32, #tpu.memory_space<vmem>>) attributes {dimension_semantics = [#tpu.dimension_semantics<parallel>, #tpu.dimension_semantics<arbitrary>], iteration_bounds = array<i64: 10, 2>, scalar_prefetch = 2 : i64, scratch_operands = 1 : i64, tpu.core_type = #tpu.core_type<tc>, window_params = [{transform_indices = @transform_0, window_bounds = array<i64: 16, 128>}, {transform_indices = @transform_1, window_bounds = array<i64: 1, 128, 128>}, {transform_indices = @transform_2, window_bounds = array<i64: 1, 128, 128>}, {transform_indices = @transform_3, window_bounds = array<i64: 1, 128, 128>}, {transform_indices = @transform_4, window_bounds = array<i64: 16, 1>}, {transform_indices = @transform_5, window_bounds = array<i64: 16, 128>}]} {
    %c0_i32 = arith.constant 0 : i32
    %0 = arith.cmpi eq, %arg1, %c0_i32 : i32
    %1 = arith.extui %0 : i1 to i32
    %c0_i32_0 = arith.constant 0 : i32
    %2 = arith.cmpi ne, %1, %c0_i32_0 : i32
    scf.if %2 {
      %cst = arith.constant 0.000000e+00 : f32
      %11 = vector.broadcast %cst : f32 to vector<16x128xf32>
      %c0 = arith.constant 0 : index
      %c0_4 = arith.constant 0 : index
      %12 = vector.load %arg10[%c0, %c0_4] : memref<16x128xf32, #tpu.memory_space<vmem>>, vector<16x128xf32>
      tpu.vector_store %arg10[%c0, %c0_4], %11 {strides = array<i32>} : memref<16x128xf32, #tpu.memory_space<vmem>>, vector<16x128xf32>,
    } else {
    }
    %3 = arith.index_cast %arg0 : i32 to index
    %4 = memref.load %arg3[%3] : memref<10xi32, #tpu.memory_space<smem>>
    %c0_i32_1 = arith.constant 0 : i32
    %5 = arith.cmpi sgt, %4, %c0_i32_1 : i32
    %6 = arith.extui %5 : i1 to i32
    %c0_i32_2 = arith.constant 0 : i32
    %7 = arith.cmpi ne, %6, %c0_i32_2 : i32
    scf.if %7 {
      %c0 = arith.constant 0 : index
      %c0_4 = arith.constant 0 : index
      %11 = vector.load %arg4[%c0, %c0_4] : memref<16x128xbf16, #tpu.memory_space<vmem>>, vector<16x128xbf16>
      %c0_5 = arith.constant 0 : index
      %c0_6 = arith.constant 0 : index
      %c0_7 = arith.constant 0 : index
      %12 = vector.load %arg5[%c0_5, %c0_6, %c0_7] : memref<1x128x128xbf16, #tpu.memory_space<vmem>>, vector<1x128x128xbf16>
      %13 = vector.shape_cast %12 : vector<1x128x128xbf16> to vector<128x128xbf16>
      %cst = arith.constant dense<0.000000e+00> : vector<16x128xf32>
      %14 = tpu.matmul %11, %13, %cst {dimension_numbers = #tpu.dot_dimension_numbers<[1], [0], [0], [1], [0, 0, 1, 1], [], []>} : vector<16x128xbf16>, vector<128x128xbf16>, vector<16x128xf32> -> vector<16x128xf32>
      %c0_8 = arith.constant 0 : index
      %c0_9 = arith.constant 0 : index
      %c0_10 = arith.constant 0 : index
      %15 = vector.load %arg6[%c0_8, %c0_9, %c0_10] : memref<1x128x128xbf16, #tpu.memory_space<vmem>>, vector<1x128x128xbf16>
      %16 = vector.shape_cast %15 : vector<1x128x128xbf16> to vector<128x128xbf16>
      %cst_11 = arith.constant dense<0.000000e+00> : vector<16x128xf32>
      %17 = tpu.matmul %11, %16, %cst_11 {dimension_numbers = #tpu.dot_dimension_numbers<[1], [0], [0], [1], [0, 0, 1, 1], [], []>} : vector<16x128xbf16>, vector<128x128xbf16>, vector<16x128xf32> -> vector<16x128xf32>
      %18 = arith.negf %14 : vector<16x128xf32>
      %19 = math.exp %18 : vector<16x128xf32>
      %cst_12 = arith.constant 1.000000e+00 : f32
      %20 = vector.broadcast %cst_12 : f32 to vector<16x128xf32>
      %21 = arith.addf %20, %19 : vector<16x128xf32>
      %22 = arith.divf %20, %21 : vector<16x128xf32>
      %23 = arith.mulf %14, %22 : vector<16x128xf32>
      %24 = arith.mulf %23, %17 : vector<16x128xf32>
      %c0_13 = arith.constant 0 : index
      %c0_14 = arith.constant 0 : index
      %25 = vector.load %arg10[%c0_13, %c0_14] : memref<16x128xf32, #tpu.memory_space<vmem>>, vector<16x128xf32>
      %26 = arith.truncf %24 : vector<16x128xf32> to vector<16x128xbf16>
      %c0_15 = arith.constant 0 : index
      %c0_16 = arith.constant 0 : index
      %c0_17 = arith.constant 0 : index
      %27 = vector.load %arg7[%c0_15, %c0_16, %c0_17] : memref<1x128x128xbf16, #tpu.memory_space<vmem>>, vector<1x128x128xbf16>
      %28 = vector.shape_cast %27 : vector<1x128x128xbf16> to vector<128x128xbf16>
      %cst_18 = arith.constant dense<0.000000e+00> : vector<16x128xf32>
      %29 = tpu.matmul %26, %28, %cst_18 {dimension_numbers = #tpu.dot_dimension_numbers<[1], [0], [0], [1], [0, 0, 1, 1], [], []>} : vector<16x128xbf16>, vector<128x128xbf16>, vector<16x128xf32> -> vector<16x128xf32>
      %30 = arith.addf %25, %29 : vector<16x128xf32>
      %c0_19 = arith.constant 0 : index
      %c0_20 = arith.constant 0 : index
      %31 = vector.load %arg10[%c0_19, %c0_20] : memref<16x128xf32, #tpu.memory_space<vmem>>, vector<16x128xf32>
      tpu.vector_store %arg10[%c0_19, %c0_20], %30 {strides = array<i32>} : memref<16x128xf32, #tpu.memory_space<vmem>>, vector<16x128xf32>,
    } else {
    }
    %c1_i32 = arith.constant 1 : i32
    %8 = arith.cmpi eq, %arg1, %c1_i32 : i32
    %9 = arith.extui %8 : i1 to i32
    %c0_i32_3 = arith.constant 0 : i32
    %10 = arith.cmpi ne, %9, %c0_i32_3 : i32
    scf.if %10 {
      %c0 = arith.constant 0 : index
      %c0_4 = arith.constant 0 : index
      %11 = vector.load %arg10[%c0, %c0_4] : memref<16x128xf32, #tpu.memory_space<vmem>>, vector<16x128xf32>
      %c0_5 = arith.constant 0 : index
      %c0_6 = arith.constant 0 : index
      %12 = vector.load %arg8[%c0_5, %c0_6] : memref<16x1xf32, #tpu.memory_space<vmem>>, vector<16x1xf32>
      %13 = vector.broadcast %12 : vector<16x1xf32> to vector<16x128xf32>
      %14 = arith.mulf %11, %13 : vector<16x128xf32>
      %15 = arith.truncf %14 : vector<16x128xf32> to vector<16x128xbf16>
      %c0_7 = arith.constant 0 : index
      %c0_8 = arith.constant 0 : index
      %16 = vector.load %arg9[%c0_7, %c0_8] : memref<16x128xbf16, #tpu.memory_space<vmem>>, vector<16x128xbf16>
      tpu.vector_store %arg9[%c0_7, %c0_8], %15 {strides = array<i32>} : memref<16x128xbf16, #tpu.memory_space<vmem>>, vector<16x128xbf16>,
    } else {
    }
    return
  }
  func.func @transform_0(%arg0: i32, %arg1: i32, %arg2: memref<10xi32, #tpu.memory_space<smem>>, %arg3: memref<10xi32, #tpu.memory_space<smem>>) -> (i32, i32) {
    %c0_i32 = arith.constant 0 : i32
    %c0_i32_0 = arith.constant 0 : i32
    return %arg0, %c0_i32 : i32, i32
  }
  func.func @transform_1(%arg0: i32, %arg1: i32, %arg2: memref<10xi32, #tpu.memory_space<smem>>, %arg3: memref<10xi32, #tpu.memory_space<smem>>) -> (i32, i32, i32) {
    %0 = arith.index_cast %arg0 : i32 to index
    %1 = memref.load %arg2[%0] : memref<10xi32, #tpu.memory_space<smem>>
    %c0_i32 = arith.constant 0 : i32
    %c0_i32_0 = arith.constant 0 : i32
    return %1, %c0_i32, %arg1 : i32, i32, i32
  }
  func.func @transform_2(%arg0: i32, %arg1: i32, %arg2: memref<10xi32, #tpu.memory_space<smem>>, %arg3: memref<10xi32, #tpu.memory_space<smem>>) -> (i32, i32, i32) {
    %0 = arith.index_cast %arg0 : i32 to index
    %1 = memref.load %arg2[%0] : memref<10xi32, #tpu.memory_space<smem>>
    %c0_i32 = arith.constant 0 : i32
    %c0_i32_0 = arith.constant 0 : i32
    return %1, %c0_i32, %arg1 : i32, i32, i32
  }
  func.func @transform_3(%arg0: i32, %arg1: i32, %arg2: memref<10xi32, #tpu.memory_space<smem>>, %arg3: memref<10xi32, #tpu.memory_space<smem>>) -> (i32, i32, i32) {
    %0 = arith.index_cast %arg0 : i32 to index
    %1 = memref.load %arg2[%0] : memref<10xi32, #tpu.memory_space<smem>>
    %c0_i32 = arith.constant 0 : i32
    %c0_i32_0 = arith.constant 0 : i32
    return %1, %arg1, %c0_i32 : i32, i32, i32
  }
  func.func @transform_4(%arg0: i32, %arg1: i32, %arg2: memref<10xi32, #tpu.memory_space<smem>>, %arg3: memref<10xi32, #tpu.memory_space<smem>>) -> (i32, i32) {
    %c0_i32 = arith.constant 0 : i32
    %c0_i32_0 = arith.constant 0 : i32
    return %arg0, %c0_i32 : i32, i32
  }
  func.func @transform_5(%arg0: i32, %arg1: i32, %arg2: memref<10xi32, #tpu.memory_space<smem>>, %arg3: memref<10xi32, #tpu.memory_space<smem>>) -> (i32, i32) {
    %c0_i32 = arith.constant 0 : i32
    %c0_i32_0 = arith.constant 0 : i32
    return %arg0, %c0_i32 : i32, i32
  }
}

</mosaic_0001>

<bundles_post_ra>
// kernel: tpu_custom_call.1
= control target key start
LH: loop header
LB: loop body
LE: loop exit
PB: predicated region body
PF: predicated region fallthrough
CT: control target
= control target key end

     0   :  { %s1571_s30 = smov [#allocation4]   ;;  %s1572_s8 = smov [#allocation5]   ;;  %s2095_s0 = inlined_call_operand.vmem [shape: s32[10], index: 0, kind: input, shape index: {}]   ;;  %s2096_s2 = inlined_call_operand.vmem [shape: bf16[160,128], index: 2, kind: input, shape index: {}]   ;;  %s2097_s3 = inlined_call_operand.hbm [shape: bf16[8,128,256], index: 3, kind: input, shape index: {}]   ;;  %s2098_s4 = inlined_call_operand.hbm [shape: bf16[8,128,256], index: 4, kind: input, shape index: {}]   ;;  %s2099_s5 = inlined_call_operand.hbm [shape: bf16[8,256,128], index: 5, kind: input, shape index: {}]   ;;  %s2100_s6 = inlined_call_operand.vmem [shape: f32[160,1], index: 6, kind: input, shape index: {}]   ;;  %s2101_s7 = inlined_call_operand.hbm [shape: bf16[160,128], index: 7, kind: output, shape index: {}]   ;;  %s2102_s1 = inlined_call_operand.vmem [shape: s32[10], index: 1, kind: input, shape index: {}]  }
   0x1   :  { %2131 = sst [smem:[#allocation42_spill]] %s2096_s2  ;;  %s13_s26 = sshll.u32 %s2095_s0, 4  ;;  %s14_s26 = int_to_ptr.vmem [resolvable:$true] %s13_s26 }
   0x2   :  { %2132 = sst [smem:[#allocation43_spill]] %s2098_s4  ;;  %s18_s29 = sshll.u32 %s2102_s1, 4  ;;  %s19_s29 = int_to_ptr.vmem [resolvable:$true] %s18_s29 }
   0x3   :  { %2133 = sst [smem:[#allocation44_spill]] %s2100_s6 }
   0x4   :  { %2134 = sst [smem:[#allocation45_spill]] %s2101_s7 }
   0x5   :  { %16 = dma.vmem_to_smem %s14_s26, 16, %s1571_s30, [#allocation3] }
   0x6   :  { %21 = dma.vmem_to_smem %s19_s29, 16, %s1572_s8, [#allocation3] }
   0x7   :  { %1485 = dma.done.wait [#allocation3], 32 }
   0x8   :  { %1486 = vsyncadd [#allocation3], 4294967264 }
   0x9   :  { %24 = sfence }
   0xa   :  { %25 = vsyncpa [#allocation7], 0 }
   0xb   :  { %27 = vsyncpa [#allocation7 + $0x1], 0 }
   0xc   :  { %28 = vsyncpa [#allocation10], 0 }
   0xd   :  { %30 = vsyncpa [#allocation10 + $0x1], 0 }
   0xe   :  { %31 = vsyncpa [#allocation8], 0 }
   0xf   :  { %33 = vsyncpa [#allocation8 + $0x1], 0  ;;  %s1626_s0 = smov 0   ;;  %s1628_s9 = smov 0  }
  0x10   :  { %s1630_s1 = smov 0   ;;  %s1632_s10 = smov 0  }
  0x11   :  { %s1634_s11 = smov 0   ;;  %s1636_s12 = smov 0  }
  0x12   :  { %s1638_s13 = smov 0   ;;  %s1640_s14 = smov 0  }
  0x13   :  { %s1642_s15 = smov 0   ;;  %s1644_s16 = smov 0  }
  0x14   :  { %s1646_s17 = smov 0   ;;  %s1648_s18 = smov 0  }
  0x15   :  { %s1650_s19 = smov 0   ;;  %s1652_s20 = smov 0  }
  0x16   :  { %s1654_s21 = smov 0   ;;  %s1656_s22 = smov 0  }
  0x17   :  { %s1658_s23 = smov 0  }
  0x18 LB: > { %2135 = sst [smem:[#allocation24_spill]] %s1505_s0  ;;  %s1710_s24 = sadd.s32 4294967295, %s1569_s23   ;;  %s1569_s23 = sphi %s1658_s23, %s39_s23   ;;  %s1565_s22 = sphi %s1656_s22, %s2222_s22   ;;  %s1561_s21 = sphi %s1654_s21, %s2221_s21   ;;  %s1557_s20 = sphi %s1652_s20, %s2220_s20   ;;  %s1553_s19 = sphi %s1650_s19, %s2219_s19   ;;  %s1549_s18 = sphi %s1648_s18, %s2218_s18   ;;  %s1545_s17 = sphi %s1646_s17, %s2217_s17   ;;  %s1541_s16 = sphi %s1644_s16, %s2216_s16   ;;  %s1537_s15 = sphi %s1642_s15, %s2209_s15   ;;  %s1533_s14 = sphi %s1640_s14, %s2208_s14   ;;  %s1529_s13 = sphi %s1638_s13, %s2207_s13   ;;  %s1525_s12 = sphi %s1636_s12, %s2215_s12   ;;  %s1521_s11 = sphi %s1634_s11, %s2214_s11   ;;  %s1517_s10 = sphi %s1632_s10, %s2206_s10   ;;  %s1513_s1 = sphi %s1630_s1, %s2205_s1   ;;  %s1509_s9 = sphi %s1628_s9, %s2204_s9   ;;  %s1505_s0 = sphi %s1626_s0, %s2203_s0  }
  0x19   : > { %2136 = sst [smem:[#allocation25_spill]] %s1509_s9  ;;  %s922_s25 = sadd.s32 4294967294, %s1569_s23  }
  0x1a   : > { %2137 = sst [smem:[#allocation26_spill]] %s1513_s1  ;;  %s48_s26 = sadd.s32 1, %s1561_s21 }
  0x1b   : > { %2138 = sst [smem:[#allocation27_spill]] %s1521_s11  ;;  %p49_p0 = scmp.ge.s32.totalorder %s48_s26, 2 }
  0x1c   : > { %2139 = sst [smem:[#allocation28_spill]] %s1533_s14  ;;  %s51_s27 = sadd.s32 1, %s1565_s22 }
  0x1d   : > { %2140 = sst [smem:[#allocation29_spill]] %s1537_s15  ;;  %p2118_p1 = scmp.eq.s32.totalorder %s1569_s23, 0 }
  0x1e   : > { %2141 = sst [smem:[#allocation30_spill]] %s1553_s19  ;;  %p102_p2 = scmp.eq.s32.totalorder %s1710_s24, 0 }
  0x1f   : > { %2142 = sst [smem:[#allocation31_spill]] %s1557_s20  ;;  %s2224_s26 = smov (%p49_p0, %s48_s26), 0 }
  0x20   : > { %2143 = sst [smem:[#allocation32_spill]] %s2224_s26  ;;  %s2226_s27 = smov (!%p49_p0, %s51_s27), %s1565_s22 }
  0x21   : > { %s1722_s28 = ssub.s32 %s1561_s21, %s2224_s26  ;;  %s111_s29 = sld [smem:[#allocation4 + %s1565_s22]] }
  0x22   : > { %p53_p3 = scmp.ge.s32.totalorder %s2226_s27, 10  ;;  %s118_s30 = sadd.s32 1, %s1537_s15 }
  0x23   : > { %p125_p4 = scmp.ne.s32.totalorder %s1537_s15, %s1533_s14  ;;  %p131_p5 = scmp.ne.s32.totalorder %s1533_s14, %s1529_s13 }
  0x24   : > { %s2228_s27 = smov (%p53_p3, %s2226_s27), 0  ;;  %s200_s26 = sadd.s32 1, %s1513_s1 }
  0x25   : > { %2144 = sst [smem:[#allocation33_spill]] %s2228_s27  ;;  %p1733_p6 = por %p131_p5, %p102_p2 }
  0x26   : > { %s112_s7 = sld [smem:[#allocation4 + %s2228_s27]]  ;;  %s197_s19 = ssub.s32 %s1565_s22, %s2228_s27 }
  0x27   : > { %s2145_s8 = scalar_select %p1733_p6, 1, 0 }
  0x28   : > { %p198_p7 = scmp.eq.s32.totalorder %s197_s19, 0  ;;  %p210_p8 = scmp.ne.s32.totalorder %s1513_s1, %s1509_s9 }
  0x29   : > { %2146 = sst [smem:[#allocation34_spill]] %s2145_s8  ;;  %p211_p9 = scmp.eq.s32.totalorder %s1710_s24, 19 }
  0x2a   : > { %p216_p10 = scmp.ne.s32.totalorder %s1509_s9, %s1505_s0  ;;  %p217_p12 = scmp.eq.s32.totalorder %s922_s25, 19 }
  0x2b   : > { %s1747_s13 = scalar_select %p198_p7, %s1513_s1, %s200_s26  }
  0x2c   : > { %p1749_p11 = por %p211_p9, %p210_p8  ;;  %p1758_p13 = por %p125_p4, %p2118_p1 }
  0x2d   : > { %2147 = sst [smem:[#allocation35_spill]] %s1747_s13  ;;  %s113_s19 = ssub.s32 %s111_s29, %s112_s7 }
  0x2e   : > { %s2148_s6 = scalar_select %p1749_p11, 1, 0 }
  0x2f   : > { %p1762_p0 = por %p217_p12, %p216_p10  ;;  %s115_s13 = sor.u32 %s113_s19, %s1722_s28 }
  0x30   : > { %2149 = sst [smem:[#allocation36_spill]] %s2148_s6  ;;  %p2117_p3 = scmp.lt.s32.totalorder %s1569_s23, 20 }
  0x31   : > { %s2151_s26 = scalar_select %p1762_p0, 1, 0 }
  0x32   : > { %p116_p5 = scmp.eq.s32.totalorder %s115_s13, 0  ;;  %s270_s1 = sand.u32 1, %s1569_s23  }
  0x33   : > { %2152 = sst [smem:[#allocation37_spill]] %s2151_s26  ;;  %s272_s0 = sand.u32 1, %s1537_s15  }
  0x34   : > { %s1769_s25 = scalar_select %p116_p5, %s1537_s15, %s118_s30  }
  0x35   : > { %s928_s6 = sshll.u32 %s272_s0, 6  ;;  %p1777_p4 = pnand %p2117_p3, %p1758_p13 }
  0x36   : > { %2153 = sst [smem:[#allocation38_spill]] %s1769_s25  ;;  %p935_p7 = scmp.ge.s32.totalorder %s1569_s23, 1 }
  0x37   : > { %s1088_s7 = scalar_select %p1758_p13, [#allocation4], [#allocation14] }
  0x38   : > { %s1089_s29 = scalar_select %p1758_p13, %s1565_s22, 0 }
  0x39   : > { %s2230_s7 = smov (!%p2117_p3, %s1088_s7), [#allocation17]  ;;  %s274_s0 = scalar_lea.vmem [#allocation9], %s928_s6 }
  0x3a   : > { %s2232_s29 = smov (!%p2117_p3, %s1089_s29), 0  ;;  %s1791_s30 = sshll.u32 %s274_s0, 4 }
  0x3b   : > { %2155 = sst [smem:[#allocation39_spill]] %s1791_s30  ;;  %p326_p8 = scmp.lt.s32.totalorder %s1569_s23, 21 }
  0x3c   : > { %s275_s13 = sld [smem:[%s2230_s7 + %s2232_s29]]  ;;  %s1809_s7 = scalar_lea.sflag [#allocation10], %s270_s1 }
  0x3d   : > { %p1795_p9 = pnand %p935_p7, %p326_p8  ;;  %s1801_s26 = sld [smem:[#allocation4 + %s1565_s22]] }
  0x3e   : > { %s2157_s4 = sld [smem:[#allocation43_spill]]  ;;  %p1303_p13 = pneg %p1777_p4 }
  0x3f   : > { %s82_s0 = sld [smem:[#allocation4 + %s2228_s27]] }
  0x42   : > { %s929_s2 = sshll.u32 %s275_s13, 5 }
  0x43   : > { %s279_s25 = sadd.s32 %s1561_s21, %s929_s2 }
  0x44   : > { %s930_s15 = sshll.u32 %s279_s25, 2  ;;  %s1306_s2 = scalar_lea.hbm %s2157_s4, 1024 }
  0x45   : > { %s281_s6 = scalar_lea.hbm %s2157_s4, %s930_s15 }
  0x46   : > { %s282_s14 = sshll.u32 %s281_s6, 4  ;;  %s283_s14 = int_to_ptr.hbm [resolvable:$true] %s282_s14 }
  0x47   : > { %s1299_s29 = sshra.s32 %s283_s14, 4  ;;  %s1300_s29 = int_to_ptr.hbm [resolvable:$true] %s1299_s29 }
  0x48   : > { %s1301_s30 = scalar_lea.hbm %s1300_s29, 64  ;;  %p1307_p8 = scmp.lt.s32.totalorder %s1300_s29, %s2157_s4 }
  0x49   : > { %p1302_p12 = scmp.ne.s32.totalorder %s1300_s29, %s1301_s30  ;;  %p1308_p3 = scmp.lt.s32.totalorder %s1306_s2, %s1301_s30 }
  0x4b   : > { %p1304_p5 = pnand %p1303_p13, %p1302_p12  ;;  %p1309_p1 = por %p1308_p3, %p1307_p8 }
  0x4d   : > { %p1305_p7 = pneg %p1304_p5 }
  0x4f   : > { %p1310_p10 = pnand %p1309_p1, %p1305_p7 }
  0x51   : > { %1313 = shalt.err (!%p1310_p10)
}
  0x52   : > { %s2119_s1 = smov 128   ;;  %s2158_s8 = sld [smem:[#allocation39_spill]] }
  0x53   : > { %s2120_s30 = smov 64   ;;  %s2122_s6 = smov 4  }
  0x54   : > { %p101_p1 = scmp.ne.s32.totalorder %s1545_s17, %s1541_s16  ;;  %s88_s25 = sadd.s32 1, %s1549_s18 }
  0x55   : > { %s2124_s13 = sand.u32 1, %s1549_s18   ;;  %s83_s2 = ssub.s32 %s1801_s26, %s82_s0 }
  0x56   : > { %p1834_p3 = por %p102_p2, %p101_p1  ;;  %s85_s20 = sor.u32 %s1722_s28, %s83_s2 }
  0x57   : > { %p2161_p10 = scmp.ne.s32.totalorder %s1549_s18, %s1545_s17  ;;  %p2162_p12 = scmp.eq.s32.totalorder %s1569_s23, 0 }
  0x58   : > { %s2159_s29 = int_to_ptr.vmem [resolvable:$true] %s2158_s8  ;;  %p2163_p5 = scmp.lt.s32.totalorder %s1569_s23, 20 }
  0x59   : > { %1109 = dma.hbm_to_vmem [thread:$0]  (!%p1777_p4), %s283_s14, 1024, %s2159_s29, %s1809_s7, %s2119_s1, %s2120_s30, %s2122_s6  }
  0x5a   : > { %p97_p13 = por %p2162_p12, %p2161_p10  ;;  %p86_p4 = scmp.eq.s32.totalorder %s85_s20, 0 }
  0x5b   : > { %s925_s14 = sshll.u32 %s2124_s13, 6  ;;  %p2166_p8 = pmov %p2163_p5 }
  0x5c   : > { %p1848_p7 = pnand %p2163_p5, %p97_p13  ;;  %p2167_p1 = pmov %p2163_p5 }
  0x5d   : > { %s1853_s26 = scalar_select %p86_p4, %s1549_s18, %s88_s25  }
  0x5e   : > { %s1085_s0 = scalar_select %p97_p13, [#allocation4], [#allocation13] }
  0x5f   : > { %2165 = sst [smem:[#allocation40_spill]] %s1853_s26  ;;  %s250_s29 = scalar_lea.vmem [#allocation6], %s925_s14 }
  0x60   : > { %s1086_s15 = scalar_select %p97_p13, %s1565_s22, 0 }
  0x61   : > { %s2234_s0 = smov (!%p2166_p8, %s1085_s0), [#allocation16]  ;;  %s1860_s2 = sshll.u32 %s250_s29, 4 }
  0x62   : > { %s2236_s15 = smov (!%p2167_p1, %s1086_s15), 0  ;;  %2168 = sst [smem:[#allocation39_spill]] %s1860_s2 }
  0x63   : > { %s251_s8 = sld [smem:[%s2234_s0 + %s2236_s15]]  ;;  %p155_p10 = scmp.ne.s32.totalorder %s1525_s12, %s1521_s11 }
  0x64   : > { %s141_s20 = sld [smem:[#allocation4 + %s1565_s22]]  ;;  %p161_p12 = scmp.ne.s32.totalorder %s1521_s11, %s1517_s10 }
  0x65   : > { %s142_s1 = sld [smem:[#allocation4 + %s2228_s27]]  ;;  %s148_s6 = sadd.s32 1, %s1525_s12 }
  0x66   : > { %p1873_p13 = por %p161_p12, %p102_p2  ;;  %p2171_p4 = scmp.eq.s32.totalorder %s1569_s23, 0 }
  0x67   : > { %s2173_s2 = sand.u32 1, %s1549_s18   ;;  %p1333_p8 = pneg %p1848_p7 }
  0x68   : > { %s2169_s4 = scalar_select %p1873_p13, 1, 0 }
  0x69   : > { %s926_s25 = sshll.u32 %s251_s8, 5  ;;  %p1882_p5 = por %p155_p10, %p2171_p4 }
  0x6a   : > { %s255_s30 = sadd.s32 %s1561_s21, %s926_s25  ;;  %2170 = sst [smem:[#allocation41_spill]] %s2169_s4 }
  0x6b   : > { %s927_s13 = sshll.u32 %s255_s30, 2  ;;  %s143_s8 = ssub.s32 %s141_s20, %s142_s1 }
  0x6c   : > { %s257_s15 = scalar_lea.hbm %s2097_s3, %s927_s13  ;;  %s145_s25 = sor.u32 %s143_s8, %s1722_s28 }
  0x6d   : > { %s258_s10 = sshll.u32 %s257_s15, 4  ;;  %s247_s30 = scalar_lea.sflag [#allocation7], %s2173_s2  ;;  %s259_s10 = int_to_ptr.hbm [resolvable:$true] %s258_s10 }
  0x6e   : > { %s1329_s27 = sshra.s32 %s259_s10, 4  ;;  %s1336_s0 = scalar_lea.hbm %s2097_s3, 1024  ;;  %s1330_s27 = int_to_ptr.hbm [resolvable:$true] %s1329_s27 }
  0x6f   : > { %s1331_s26 = scalar_lea.hbm %s1330_s27, 64  ;;  %p1337_p10 = scmp.lt.s32.totalorder %s1330_s27, %s2097_s3 }
  0x70   : > { %p1332_p2 = scmp.ne.s32.totalorder %s1330_s27, %s1331_s26  ;;  %p1338_p4 = scmp.lt.s32.totalorder %s1336_s0, %s1331_s26 }
  0x72   : > { %p1334_p1 = pnand %p1333_p8, %p1332_p2  ;;  %p1339_p0 = por %p1338_p4, %p1337_p10 }
  0x74   : > { %p1335_p12 = pneg %p1334_p1 }
  0x76   : > { %p1340_p11 = pnand %p1339_p0, %p1335_p12 }
  0x78   : > { %1343 = shalt.err (!%p1340_p11)
}
  0x79   : > { %s2174_s28 = smov 4   ;;  %s2175_s1 = smov 64  }
  0x7a   : > { %s2176_s2 = smov 128   ;;  %s2177_s20 = sld [smem:[#allocation39_spill]] }
  0x7b   : > { %p146_p0 = scmp.eq.s32.totalorder %s145_s25, 0  ;;  %s296_s4 = sand.u32 1, %s1525_s12  }
  0x7c   : > { %s1091_s11 = scalar_select %p1882_p5, [#allocation4], [#allocation15] }
  0x7d   : > { %s1908_s27 = scalar_select %p146_p0, %s1525_s12, %s148_s6  }
  0x7e   : > { %s1092_s16 = scalar_select %p1882_p5, %s1565_s22, 0 }
  0x7f   : > { %p2179_p11 = scmp.lt.s32.totalorder %s1569_s23, 20  ;;  %s931_s26 = sshll.u32 %s296_s4, 6 }
  0x80   : > { %s2178_s15 = int_to_ptr.vmem [resolvable:$true] %s2177_s20 }
  0x81   : > { %1104 = dma.hbm_to_vmem [thread:$0]  (!%p1848_p7), %s259_s10, 1024, %s2178_s15, %s247_s30, %s2176_s2, %s2175_s1, %s2174_s28  }
  0x82   : > { %s2238_s11 = smov (!%p2179_p11, %s1091_s11), [#allocation18]  ;;  %p2180_p2 = pmov %p2179_p11 }
  0x83   : > { %s932_s10 = sshll.u32 %s1561_s21, 4  ;;  %s298_s30 = scalar_lea.vmem [#allocation11], %s931_s26 }
  0x84   : > { %s2240_s16 = smov (!%p2180_p2, %s1092_s16), 0  ;;  %p2181_p8 = pmov %p2180_p2 }
  0x85   : > { %s299_s8 = sld [smem:[%s2238_s11 + %s2240_s16]]  ;;  %s309_s6 = sshll.u32 %s298_s30, 4  ;;  %s310_s6 = int_to_ptr.vmem [resolvable:$true] %s309_s6 }
  0x86   : > { %p1921_p1 = pnand %p2181_p8, %p1882_p5 }
  0x88   : > { %p1363_p5 = pneg %p1921_p1 }
  0x8b   : > { %s933_s25 = sshll.u32 %s299_s8, 5  ;;  %s1366_s8 = scalar_lea.hbm %s2099_s5, 1024 }
  0x8c   : > { %s304_s14 = sadd.s32 %s933_s25, %s932_s10 }
  0x8d   : > { %s934_s0 = sshll.u32 %s304_s14, 2 }
  0x8e   : > { %s306_s15 = scalar_lea.hbm %s2099_s5, %s934_s0 }
  0x8f   : > { %s307_s4 = sshll.u32 %s306_s15, 4  ;;  %s308_s4 = int_to_ptr.hbm [resolvable:$true] %s307_s4 }
  0x90   : > { %s1359_s29 = sshra.s32 %s308_s4, 4  ;;  %s1360_s29 = int_to_ptr.hbm [resolvable:$true] %s1359_s29 }
  0x91   : > { %s1361_s11 = scalar_lea.hbm %s1360_s29, 64  ;;  %p1367_p4 = scmp.lt.s32.totalorder %s1360_s29, %s2099_s5 }
  0x92   : > { %p1362_p7 = scmp.ne.s32.totalorder %s1360_s29, %s1361_s11  ;;  %p1368_p0 = scmp.lt.s32.totalorder %s1366_s8, %s1361_s11 }
  0x94   : > { %p1364_p12 = pnand %p1363_p5, %p1362_p7  ;;  %p1369_p11 = por %p1368_p0, %p1367_p4 }
  0x96   : > { %p1365_p10 = pneg %p1364_p12 }
  0x98   : > { %p1370_p2 = pnand %p1369_p11, %p1365_p10 }
  0x9a   : > { %1373 = shalt.err (!%p1370_p2)
}
  0x9b   : > { %1114 = dma.hbm_to_vmem [thread:$0]  (!%p1921_p1), %s308_s4, 1024, %s310_s6, %s1809_s7, %s2175_s1, %s2175_s1, %s2174_s28  }
  0x9c   : > { %330 = sbr.rel (%p1795_p9) target bundleno = 731 (0x2db), region = 40  ;;  %s332_s30 = sand.u32 (!%p1795_p9), 1, %s1545_s17  }
  0x9d   : > { %s936_s14 = sshll.u32 (!%p1795_p9), %s332_s30, 6  ;;  %s333_s0 = scalar_lea.sflag (!%p1795_p9), [#allocation7], %s332_s30 }
  0x9e   : > { %s1946_s2 = scalar_lea.vmem (!%p1795_p9), [#allocation6], %s936_s14 }
  0xa1   : > { %1488 = dma.done.wait (%p1834_p3), %s333_s0, 1024  }
  0xa2   : > { %1490 = vsyncadd (%p1834_p3), %s333_s0, 4294966272  ;;  %s2183_s13 = sld [smem:[#allocation28_spill]]  ;;  %s342_s15 = sand.u32 1, %s1710_s24  }
  0xa3   : > { %s343_s19 = scalar_lea.sflag [#allocation10], %s342_s15 }
  0xa8   : > { %s344_s7 = sand.u32 1, %s2183_s13  }
  0xa9   : > { %s937_s28 = sshll.u32 %s344_s7, 6 }
  0xaa   : > { %s1954_s1 = scalar_lea.vmem [#allocation9], %s937_s28 }
  0xab   : > { %1492 = dma.done.wait (%p1733_p6), %s343_s19, 1024  }
  0xac   : > { %1494 = vsyncadd (%p1733_p6), %s343_s19, 4294966272  ;;  %s2185_s6 = sld [smem:[#allocation27_spill]] }
  0xb2   : > { %s354_s29 = sand.u32 1, %s2185_s6  }
  0xb3   : > { %s938_s11 = sshll.u32 %s354_s29, 6 }
  0xb4   : > { %s1961_s9 = scalar_lea.vmem [#allocation11], %s938_s11 }
  0xb5   : > { %1496 = dma.done.wait (%p1873_p13), %s343_s19, 1024  }
  0xb6   : > { %1498 = vsyncadd (%p1873_p13), %s343_s19, 4294966272  ;;  %s2187_s24 = sld [smem:[#allocation25_spill]] }
  0xb7   : > { %s2188_s16 = sld [smem:[#allocation31_spill]] }
  0xb8   : > { %s2189_s13 = sld [smem:[#allocation42_spill]] }
  0xb9   : > { %s2190_s28 = sld [smem:[#allocation44_spill]] }
  0xba   : > { %s2191_s4 = sld [smem:[#allocation30_spill]] }
  0xbc   : > { %s401_s26 = sand.u32 1, %s2187_s24  }
  0xbd   : > { %s940_s8 = sshll.u32 %s2188_s16, 1  ;;  %s1971_s10 = sshll.u32 %s401_s26, 3 }
  0xbe   : > { %p405_p6 = scmp.lt.s32.totalorder %s940_s8, 19  ;;  %s403_s6 = scalar_lea.vmem [#allocation12], %s1971_s10 }
  0xc0   : > { %s2242_s8 = smov (!%p405_p6, %s940_s8), 19  ;;  %p944_p9 = scmp.ne.s32.totalorder %s2191_s4, 0 }
  0xc1   : > { %s941_s25 = sshll.u32 %s2242_s8, 2  ;;  %s943_s30 = sshll.u32 %s2242_s8, 3 }
  0xc2   : > { %s1976_s20 = scalar_lea.vmem %s2189_s13, %s941_s25  ;;  %s1981_s19 = scalar_lea.vmem %s2190_s28, %s943_s30 }
  0xc3   : > { %424 = sbr.rel (%p944_p9) target bundleno = 203 (0xcb), region = 56 }
  0xc8   : > { %v1576_v0 = vmov 0.0  }
  0xc9   : > { %425 = vst [vmem:[#allocation2] sm:$0xff] %v1576_v0 }
  0xca   : > { %426 = vst [vmem:[#allocation2 + $0x8] sm:$0xff] %v1576_v0 }
  0xcb PF: > { %s2192_s29 = sld [smem:[#allocation31_spill]] }
  0xd1   : > { %s427_s11 = sld [smem:[#allocation5 + %s2192_s29]] }
  0xd7   : > { %p945_p3 = scmp.le.s32.totalorder %s427_s11, 0 }
  0xd9   : > { %431 = sbr.rel (%p945_p3) target bundleno = 565 (0x235), region = 60 }
  0xde   : > { %v1062_v1 = vld [vmem:[%s1946_s2 + $0x38] sm:$0xff]  ;;  %v1061_v2 = vld [vmem:[%s1946_s2 + $0x30] sm:$0xff]  ;;  %v1060_v5 = vld [vmem:[%s1946_s2 + $0x28] sm:$0xff] }
  0xdf   : > { %504 = vmatpush.bf16.msra.mxu0 %v1062_v1  ;;  %v1070_v3 = vld [vmem:[%s1954_s1 + $0x38] sm:$0xff]  ;;  %v1069_v4 = vld [vmem:[%s1954_s1 + $0x30] sm:$0xff]  ;;  %v1068_v6 = vld [vmem:[%s1954_s1 + $0x28] sm:$0xff] }
  0xe0   : > { %582 = vmatpush.bf16.msra.mxu1 %v1070_v3  ;;  %v1059_v7 = vld [vmem:[%s1946_s2 + $0x20] sm:$0xff]  ;;  %v1058_v9 = vld [vmem:[%s1946_s2 + $0x18] sm:$0xff]  ;;  %v1057_v11 = vld [vmem:[%s1946_s2 + $0x10] sm:$0xff] }
  0xe1   : > { %v1067_v8 = vld [vmem:[%s1954_s1 + $0x20] sm:$0xff]  ;;  %v1066_v10 = vld [vmem:[%s1954_s1 + $0x18] sm:$0xff]  ;;  %v1065_v12 = vld [vmem:[%s1954_s1 + $0x10] sm:$0xff] }
  0xe2   : > { %v1056_v13 = vld [vmem:[%s1946_s2 + $0x8] sm:$0xff]  ;;  %v1055_v15 = vld [vmem:[%s1946_s2] sm:$0xff]  ;;  %v1054_v17 = vld [vmem:[%s1976_s20] sm:$0xff] }
  0xe3   : > { %505 = vmatpush.bf16.msra.mxu0 %v1061_v2  ;;  %v1064_v14 = vld [vmem:[%s1954_s1 + $0x8] sm:$0xff]  ;;  %v1063_v16 = vld [vmem:[%s1954_s1] sm:$0xff]  ;;  %v1078_v18 = vld [vmem:[%s1961_s9 + $0x38] sm:$0xff] }
  0xe4   : > { %583 = vmatpush.bf16.msra.mxu1 %v1069_v4  ;;  %705 = vmatpush.bf16.msra.mxu2 %v1078_v18  ;;  %v1077_v19 = vld [vmem:[%s1961_s9 + $0x30] sm:$0xff]  ;;  %v1076_v20 = vld [vmem:[%s1961_s9 + $0x28] sm:$0xff]  ;;  %v1075_v21 = vld [vmem:[%s1961_s9 + $0x20] sm:$0xff] }
  0xe5   : > { %v1074_v22 = vld [vmem:[%s1961_s9 + $0x18] sm:$0xff]  ;;  %v1073_v23 = vld [vmem:[%s1961_s9 + $0x10] sm:$0xff]  ;;  %v1072_v26 = vld [vmem:[%s1961_s9 + $0x8] sm:$0xff] }
  0xe6   : > { %v1071_v27 = vld [vmem:[%s1961_s9] sm:$0xff]  ;;  %v638_v61 = vld [vmem:[#allocation2] sm:$0xff]  ;;  %v639_v0 = vld [vmem:[#allocation2 + $0x8] sm:$0xff] }
  0xe7   : > { %506 = vmatpush.bf16.msra.mxu0 %v1060_v5 }
  0xe8   : > { %584 = vmatpush.bf16.msra.mxu1 %v1068_v6  ;;  %706 = vmatpush.bf16.msra.mxu2 %v1077_v19 }
  0xeb   : > { %507 = vmatpush.bf16.msra.mxu0 %v1059_v7 }
  0xec   : > { %585 = vmatpush.bf16.msra.mxu1 %v1067_v8  ;;  %707 = vmatpush.bf16.msra.mxu2 %v1076_v20 }
  0xef   : > { %508 = vmatpush.bf16.msra.mxu0 %v1058_v9 }
  0xf0   : > { %586 = vmatpush.bf16.msra.mxu1 %v1066_v10  ;;  %708 = vmatpush.bf16.msra.mxu2 %v1075_v21 }
  0xf3   : > { %509 = vmatpush.bf16.msra.mxu0 %v1057_v11 }
  0xf4   : > { %587 = vmatpush.bf16.msra.mxu1 %v1065_v12  ;;  %709 = vmatpush.bf16.msra.mxu2 %v1074_v22 }
  0xf7   : > { %510 = vmatpush.bf16.msra.mxu0 %v1056_v13 }
  0xf8   : > { %588 = vmatpush.bf16.msra.mxu1 %v1064_v14  ;;  %710 = vmatpush.bf16.msra.mxu2 %v1073_v23 }
  0xfb   : > { %511 = vmatpush.bf16.msra.mxu0 %v1055_v15 }
  0xfc   : > { %589 = vmatpush.bf16.msra.mxu1 %v1063_v16  ;;  %711 = vmatpush.bf16.msra.mxu2 %v1072_v26 }
  0xfe   : > { %512 = vmatmul.bf16.vlgmr.msra.gmra.mxu0 %v1054_v17 }
  0xff   : > { %590 = vmatmul.bf16.vlgmr.msra.gmra.mxu1 %v1054_v17 }
 0x100   : > { %712 = vmatpush.bf16.msra.mxu2 %v1071_v27 }
 0x17b   : > { %v513_v24 = vpop.f32.mrf.mxu0 }
 0x17c   : > { %v1014_v25 = vmul.f32 -1.442695, %v513_v24  ;;  %v591_v43 = vpop.f32.mrf.mxu1 }
 0x17e   : > { %1266 = vpow2.f32 %v1014_v25 }
 0x183   : > { %v515_v28 = vpop.f32.mrf.mxu0 }
 0x184   : > { %v1267_v29 = vpop.eup %1266  ;;  %v1015_v30 = vmul.f32 -1.442695, %v515_v28  ;;  %v593_v57 = vpop.f32.mrf.mxu1 }
 0x185   : > { %v602_v31 = vadd.f32 1.0, %v1267_v29 }
 0x186   : > { %1268 = vpow2.f32 %v1015_v30 }
 0x187   : > { %1270 = vrcp.f32 %v602_v31  ;;  %v615_v40 = vand.u32 2147483648, %v602_v31  ;;  %vm609_vm1 = vweird.f32 %v602_v31  ;;  %v613_v41 = vand.u32 2147483647, %v602_v31 }
 0x189   : > { %v616_v46 = vor.u32 1.1754944e-38, %v615_v40  ;;  %vm614_vm3 = vcmp.eq.f32.partialorder %v613_v41, 8.507059e+37 }
 0x18c   : > { %v1269_v32 = vpop.eup %1268 }
 0x18d   : > { %v1271_v33 = vpop.eup %1270  ;;  %v603_v34 = vadd.f32 1.0, %v1269_v32 }
 0x18e   : > { %v605_v35 = vmul.f32 %v1271_v33, %v602_v31  ;;  %vm610_vm0 = vweird.f32 %v1271_v33 }
 0x18f   : > { %1272 = vrcp.f32 %v603_v34  ;;  %vm611_vm2 = vmor %vm609_vm1, %vm610_vm0  ;;  %v630_v47 = vand.u32 2147483648, %v603_v34  ;;  %v628_v49 = vand.u32 2147483647, %v603_v34  ;;  %vm624_vm5 = vweird.f32 %v603_v34 }
 0x190   : > { %v606_v36 = vsub.f32 1.0, %v605_v35 }
 0x191   : > { %v631_v52 = vor.u32 1.1754944e-38, %v630_v47  ;;  %vm629_vm7 = vcmp.eq.f32.partialorder %v628_v49, 8.507059e+37 }
 0x192   : > { %v607_v37 = vmul.f32 %v1271_v33, %v606_v36 }
 0x194   : > { %v608_v38 = vadd.f32 %v1271_v33, %v607_v37 }
 0x195   : > { %v1273_v39 = vpop.eup %1272 }
 0x196   : > { %v620_v42 = vmul.f32 %v1273_v39, %v603_v34  ;;  %v612_v44 = vsel %vm611_vm2, %v1271_v33, %v608_v38  ;;  %vm625_vm4 = vweird.f32 %v1273_v39 }
 0x197   : > { %v617_v50 = vsel %vm614_vm3, %v616_v46, %v612_v44  ;;  %vm626_vm6 = vmor %vm624_vm5, %vm625_vm4 }
 0x198   : > { %v621_v45 = vsub.f32 1.0, %v620_v42  ;;  %v634_v53 = vmul.f32 %v617_v50, %v513_v24 }
 0x19a   : > { %v622_v48 = vmul.f32 %v1273_v39, %v621_v45  ;;  %v636_v58 = vmul.f32 %v634_v53, %v591_v43 }
 0x19c   : > { %v623_v51 = vadd.f32 %v1273_v39, %v622_v48 }
 0x19e   : > { %v627_v54 = vsel %vm626_vm6, %v1273_v39, %v623_v51 }
 0x19f   : > { %v632_v55 = vsel %vm629_vm7, %v631_v52, %v627_v54 }
 0x1a0   : > { %v635_v56 = vmul.f32 %v632_v55, %v515_v28 }
 0x1a2   : > { %v637_v59 = vmul.f32 %v635_v56, %v593_v57 }
 0x1a4   : > { %v640_v60 = vpack.c.bf16 %v637_v59, %v636_v58 }
 0x1a6   : > { %713 = vmatmul.bf16.vlgmr.msra.gmra.mxu2 %v640_v60 }
 0x229   : > { %v714_v62 = vpop.f32.mrf.mxu2 }
 0x22a   : > { %v719_v63 = vadd.f32 %v714_v62, %v638_v61 }
 0x22c   : > { %721 = vst [vmem:[#allocation2] sm:$0xff] %v719_v63 }
 0x231   : > { %v716_v1 = vpop.f32.mrf.mxu2 }
 0x232   : > { %v720_v2 = vadd.f32 %v716_v1, %v639_v0 }
 0x234   : > { %722 = vst [vmem:[#allocation2 + $0x8] sm:$0xff] %v720_v2 }
 0x235 PF: > { %s2193_s2 = sld [smem:[#allocation30_spill]] }
 0x23b   : > { %p1048_p13 = scmp.ne.s32.totalorder %s2193_s2, 1 }
 0x23d   : > { %726 = sbr.rel (%p1048_p13) target bundleno = 708 (0x2c4), region = 64 }
 0x242   : > { %v729_v3 = vld [vmem:[%s1981_s19] sm:$0xff]  ;;  %v1577_v4 = vmov 0   ;;  %v730_v5 = vld [vmem:[%s1981_s19 + $0x8] sm:$0xff] }
 0x243   : > { %1274 = vset.pattern.permute.xlu0 %v1577_v4  ;;  %v727_v7 = vld [vmem:[#allocation2] sm:$0xff]  ;;  %v728_v8 = vld [vmem:[#allocation2 + $0x8] sm:$0xff] }
 0x244   : > { %733 = vperm.xlu0 %1274, %v729_v3  }
 0x24c   : > { %738 = vperm.xlu0 %1274, %v730_v5  }
 0x2b6   : > { %v734_v6 = vpop.permute.xlu0 %733 }
 0x2b7   : > { %v741_v10 = vmul.f32 %v734_v6, %v727_v7 }
 0x2be   : > { %v739_v9 = vpop.permute.xlu0 %738 }
 0x2bf   : > { %v742_v11 = vmul.f32 %v739_v9, %v728_v8 }
 0x2c1   : > { %v1083_v12 = vpack.c.bf16 %v742_v11, %v741_v10 }
 0x2c3   : > { %1084 = vst [vmem:[%s403_s6] sm:$0xff] %v1083_v12  }
 0x2c4 PF: > { %s2194_s1 = sld [smem:[#allocation31_spill]]  ;;  %s760_s0 = sshll.u32 %s403_s6, 4  ;;  %s761_s0 = int_to_ptr.vmem [resolvable:$true] %s760_s0 }
 0x2c5   : > { %s2196_s24 = sld [smem:[#allocation36_spill]]  ;;  %s748_s20 = scalar_lea.sflag [#allocation8], %s401_s26 }
 0x2c6   : > { %s2197_s30 = sld [smem:[#allocation45_spill]] }
 0x2ca   : > { %s1079_s16 = sshll.u32 %s2194_s1, 3 }
 0x2cb   : > { %p2198_p1 = scmp.ne.s32.totalorder %s2196_s24, 0 }
 0x2cc   : > { %s759_s14 = scalar_lea.hbm %s2197_s30, %s1079_s16  ;;  %s1409_s4 = scalar_lea.hbm %s2197_s30, 80 }
 0x2cd   : > { %s762_s13 = sshll.u32 %s759_s14, 4  ;;  %s763_s13 = int_to_ptr.hbm [resolvable:$true] %s762_s13 }
 0x2ce   : > { %s1403_s15 = sshra.s32 %s763_s13, 4  ;;  %s1404_s15 = int_to_ptr.hbm [resolvable:$true] %s1403_s15 }
 0x2cf   : > { %s1405_s7 = scalar_lea.hbm %s1404_s15, 8  ;;  %p1410_p12 = scmp.lt.s32.totalorder %s1404_s15, %s2197_s30 }
 0x2d0   : > { %p1406_p8 = scmp.ne.s32.totalorder %s1404_s15, %s1405_s7  ;;  %p1411_p10 = scmp.lt.s32.totalorder %s1409_s4, %s1405_s7 }
 0x2d2   : > { %p1407_p7 = pnand %p1406_p8, %p2198_p1  ;;  %p1412_p4 = por %p1411_p10, %p1410_p12 }
 0x2d4   : > { %p1408_p5 = pneg %p1407_p7 }
 0x2d6   : > { %p1413_p0 = pnand %p1412_p4, %p1408_p5 }
 0x2d8   : > { %1416 = shalt.err (!%p1413_p0)
}
 0x2d9   : > { %s1578_s26 = smov 64   ;;  %s1579_s10 = smov 4  }
 0x2da   : > { %1097 = dma.vmem_to_hbm [thread:$0]  (%p2198_p1), %s761_s0, 128, %s763_s13, %s748_s20, %s1578_s26, %s1578_s26, %s1579_s10  }
 0x2db PF: > { %s2199_s6 = sld [smem:[#allocation24_spill]]  ;;  %p1120_p11 = scmp.ge.s32.totalorder %s1569_s23, 2 }
 0x2dc   : > { %s2200_s2 = sld [smem:[#allocation37_spill]] }
 0x2e1   : > { %s777_s1 = sand.u32 1, %s2199_s6  }
 0x2e2   : > { %p2201_p2 = scmp.ne.s32.totalorder %s2200_s2, 0  ;;  %s778_s9 = scalar_lea.sflag [#allocation8], %s777_s1 }
 0x2e4   : > { %p1116_p6 = pnand %p1120_p11, %p2201_p2 }
 0x2e6   : > { %p1117_p9 = pneg %p1116_p6 }
 0x2e8   : > { %1500 = dma.done.wait (%p1117_p9), %s778_s9, 128  }
 0x2e9   : > { %1502 = vsyncadd (%p1117_p9), %s778_s9, 4294967168  ;;  %s39_s23 = sadd.s32 1, %s1569_s23   ;;  %s2203_s0 = sld [smem:[#allocation25_spill]] }
 0x2ea   : > { %p2039_p3 = scmp.ge.s32.totalorder %s39_s23, 22   ;;  %s2204_s9 = sld [smem:[#allocation26_spill]] }
 0x2eb   : > { %s2205_s1 = sld [smem:[#allocation35_spill]]  ;;  %s2214_s11 = smov %s1525_s12 }
 0x2ec   : > { %s2206_s10 = sld [smem:[#allocation27_spill]]  ;;  %s2215_s12 = smov %s1908_s27 }
 0x2ed   : > { %s2207_s13 = sld [smem:[#allocation28_spill]]  ;;  %s2216_s16 = smov %s1545_s17 }
 0x2ee   : > { %s2208_s14 = sld [smem:[#allocation29_spill]]  ;;  %s2217_s17 = smov %s1549_s18 }
 0x2ef   : > { %s2209_s15 = sld [smem:[#allocation38_spill]]  ;;  %s2219_s19 = smov %s1561_s21 }
 0x2f0   : > { %s2210_s24 = sld [smem:[#allocation40_spill]]  ;;  %s2220_s20 = smov %s1565_s22 }
 0x2f1   : > { %s2211_s8 = sld [smem:[#allocation32_spill]] }
 0x2f2   : > { %s2212_s25 = sld [smem:[#allocation33_spill]] }
 0x2f4   :  { %38 = sbr.rel (!%p2039_p3) target bundleno = 24 (0x18), region = 127 }
 0x2f6   : > { %s2218_s18 = smov %s2210_s24 }
 0x2f7   : > { %s2221_s21 = smov %s2211_s8 }
 0x2f8   : > { %s2222_s22 = smov %s2212_s25 }
 0x2f9   :  { %784 = vsyncpa [#allocation7], 1 }
 0x2fa   :  { %786 = vsyncpa [#allocation7 + $0x1], 1 }
 0x2fb   :  { %787 = vsyncpa [#allocation10], 1 }
 0x2fc   :  { %789 = vsyncpa [#allocation10 + $0x1], 1 }
 0x2fd   :  { %790 = vsyncpa [#allocation8], 1 }
 0x2fe   :  { %792 = vsyncpa [#allocation8 + $0x1], 1 }

</bundles_post_ra>
